<compile_context>
chip_gen: v5e
topology: v5e:2x2
jax: 0.10.0
libtpu: 0.0.40
codegen_flags: <defaults>
</compile_context>

<pallas_src>
import functools

import jax
import jax.numpy as jnp
from jax import lax
from jax.experimental import pallas as pl
from jax.experimental.pallas import tpu as pltpu


def _round_up(x, m):
    return (x + m - 1) // m * m


# ----------------------------------------------------------------------------
# Kernel 1 (runs once at init, parameter-only work):
#   proj = table @ W_ih + (b_ih + b_hh), tiled over the vocab axis.
# Dropout is eval-mode identity, so folding the input projection into the
# embedding table is exact.
# ----------------------------------------------------------------------------
def _proj_kernel(tab_ref, w_ref, b_ref, out_ref):
    out_ref[...] = (jnp.dot(tab_ref[...], w_ref[...],
                            preferred_element_type=jnp.float32)
                    + b_ref[...])


def project_table(table_bf16, w_ih_bf16, bias_f32, v_blk):
    v_pad, e = table_bf16.shape
    four_h = w_ih_bf16.shape[1]
    return pl.pallas_call(
        _proj_kernel,
        out_shape=jax.ShapeDtypeStruct((v_pad, four_h), jnp.float32),
        grid_spec=pltpu.PrefetchScalarGridSpec(
            num_scalar_prefetch=0,
            grid=(v_pad // v_blk,),
            in_specs=[pl.BlockSpec((v_blk, e), lambda v: (v, 0)),
                      pl.BlockSpec((e, four_h), lambda v: (0, 0)),
                      pl.BlockSpec((1, four_h), lambda v: (0, 0))],
            out_specs=pl.BlockSpec((v_blk, four_h), lambda v: (v, 0)),
        ),
        compiler_params=pltpu.CompilerParams(
            dimension_semantics=("parallel",)),    # both TCs on v7x
    )(table_bf16, w_ih_bf16, bias_f32.reshape(1, four_h))


# ----------------------------------------------------------------------------
# Kernel 2 (the forward pass): fused gather + LSTM recurrence.
#   - proj lives in HBM (pl.ANY); token ids are scalar-prefetched into SMEM.
#   - Per time block of `t_blk` steps, the t_blk*batch rows of proj are
#     gathered with manual DMAs into a double-buffered VMEM scratch; block s+1
#     is prefetched while block s is computed.
#   - The recurrence keeps only h @ W_hh (bf16 MXU inputs, f32 accumulate) and
#     the elementwise gate math in the loop.
#   - Gate layout along the padded 4*H_pad axis: (i, f, o, g), each H_pad wide,
#     so all slices are 128-lane aligned.
# ----------------------------------------------------------------------------
def _enc_lstm_kernel(idx_ref, proj_hbm, whh_ref, h_out_ref, c_out_ref,
                     gx_buf, sem,
                     *, t_blk, batch, h_pad, seq_len, n_blk):
    rows_per_blk = t_blk * batch
    need_mask = (n_blk * t_blk != seq_len)

    def issue_block(blk, slot):
        # Gather the t_blk*batch proj rows of time block `blk` into slot.
        base = blk * rows_per_blk
        for t in range(t_blk):
            for b in range(batch):
                row = idx_ref[base + t * batch + b]
                pltpu.make_async_copy(
                    proj_hbm.at[pl.ds(row, 1), :],
                    gx_buf.at[slot, t, pl.ds(b, 1), :],
                    sem.at[slot],
                ).start()

    def wait_block(slot):
        # All row copies of a block share sem[slot] and have identical size:
        # drain them with rows_per_blk matching-shape waits.
        for _ in range(rows_per_blk):
            pltpu.make_async_copy(
                proj_hbm.at[pl.ds(0, 1), :],
                gx_buf.at[slot, 0, pl.ds(0, 1), :],
                sem.at[slot],
            ).wait()

    # Prologue: start gathering time block 0 into slot 0.
    issue_block(0, 0)

    def outer(blk, carry):
        h, c = carry
        slot = blk % 2

        # Prefetch the next time block while this one is drained / computed.
        @pl.when(blk + 1 < n_blk)
        def _():
            issue_block(blk + 1, 1 - slot)

        wait_block(slot)

        def step(i, hc):
            h, c = hc
            gx = gx_buf[slot, i]                              # (batch, 4*H_pad) f32
            gates = gx + jnp.dot(h.astype(jnp.bfloat16), whh_ref[...],
                                 preferred_element_type=jnp.float32)
            sig = jax.nn.sigmoid(gates[:, :3 * h_pad])        # i, f, o (128-aligned)
            g_g = jnp.tanh(gates[:, 3 * h_pad:])              # g
            i_g = sig[:, :h_pad]
            f_g = sig[:, h_pad:2 * h_pad]
            o_g = sig[:, 2 * h_pad:]
            c_new = f_g * c + i_g * g_g
            h_new = o_g * jnp.tanh(c_new)
            if need_mask:                                     # only if T was padded
                keep = (blk * t_blk + i) < seq_len
                c_new = jnp.where(keep, c_new, c)
                h_new = jnp.where(keep, h_new, h)
            return h_new, c_new

        return lax.fori_loop(0, t_blk, step, (h, c), unroll=True)

    h0 = jnp.zeros((batch, h_pad), jnp.float32)
    h_fin, c_fin = lax.fori_loop(0, n_blk, outer, (h0, h0))
    h_out_ref[...] = h_fin
    c_out_ref[...] = c_fin


def encoder_lstm_fused(idx_flat, proj_f32, w_hh_bf16,
                       *, batch, t_blk, n_blk, h_pad, seq_len):
    four_hp = 4 * h_pad
    kernel = functools.partial(_enc_lstm_kernel, t_blk=t_blk, batch=batch,
                               h_pad=h_pad, seq_len=seq_len, n_blk=n_blk)
    return pl.pallas_call(
        kernel,
        out_shape=(jax.ShapeDtypeStruct((batch, h_pad), jnp.float32),
                   jax.ShapeDtypeStruct((batch, h_pad), jnp.float32)),
        grid_spec=pltpu.PrefetchScalarGridSpec(
            num_scalar_prefetch=1,                 # token ids -> SMEM
            grid=(1,),                             # whole recurrence in one step
            in_specs=[pl.BlockSpec(memory_space=pl.ANY),        # proj stays in HBM
                      pl.BlockSpec((h_pad, four_hp), lambda g, idx: (0, 0))],
            out_specs=[pl.BlockSpec((batch, h_pad), lambda g, idx: (0, 0)),
                       pl.BlockSpec((batch, h_pad), lambda g, idx: (0, 0))],
            scratch_shapes=[
                pltpu.VMEM((2, t_blk, batch, four_hp), jnp.float32),  # dbl-buffer
                pltpu.SemaphoreType.DMA((2,)),                        # one per slot
            ],
        ),
        compiler_params=pltpu.CompilerParams(
            dimension_semantics=("arbitrary",)),
    )(idx_flat, proj_f32, w_hh_bf16)


# ----------------------------------------------------------------------------
# Encoder wrapper (parameter init + forward glue).
# ----------------------------------------------------------------------------
class EncoderPallas:
    def __init__(self, input_size, hidden_size, embedding_dim, key,
                 lstm_layer=1, dropout=0.5):
        assert lstm_layer == 1, "single-layer LSTM (matches the spec default)"
        k_emb, k_ih, k_hh, k_bih, k_bhh = jax.random.split(key, 5)
        self.vocab = input_size
        self.hidden_size = hidden_size
        h = hidden_size
        h_pad = _round_up(hidden_size, 128)        # 128-lane aligned gate slices
        self.h_pad = h_pad

        # nn.Embedding: N(0, 1); nn.LSTM params: U(-1/sqrt(H), 1/sqrt(H)).
        table = jax.random.normal(k_emb, (input_size, embedding_dim), jnp.float32)
        bound = 1.0 / float(hidden_size) ** 0.5
        w_ih_t = jax.random.uniform(k_ih, (embedding_dim, 4 * h), jnp.float32,
                                    -bound, bound)
        w_hh_t = jax.random.uniform(k_hh, (h, 4 * h), jnp.float32, -bound, bound)
        b_ih = jax.random.uniform(k_bih, (4 * h,), jnp.float32, -bound, bound)
        b_hh = jax.random.uniform(k_bhh, (4 * h,), jnp.float32, -bound, bound)
        bias = b_ih + b_hh

        # Permute PyTorch's gate order (i, f, g, o) -> kernel order (i, f, o, g)
        # and zero-pad each gate segment from H to H_pad (lane alignment).
        def pad_gates(m):
            gi = m[..., 0 * h:1 * h]
            gf = m[..., 1 * h:2 * h]
            gg = m[..., 2 * h:3 * h]
            go = m[..., 3 * h:4 * h]
            pad = [(0, 0)] * (m.ndim - 1) + [(0, h_pad - h)]
            return jnp.concatenate(
                [jnp.pad(p, pad) for p in (gi, gf, go, gg)], axis=-1)

        w_ih_p = pad_gates(w_ih_t)                           # (E, 4*H_pad)
        bias_p = pad_gates(bias)                             # (4*H_pad,)
        w_hh_p = pad_gates(w_hh_t)                           # (H, 4*H_pad)
        w_hh_p = jnp.pad(w_hh_p, ((0, h_pad - h), (0, 0)))   # zero rows: padded h
        self.w_hh_bf16 = w_hh_p.astype(jnp.bfloat16)         # cannot leak into real gates

        # Pre-project the embedding table once (parameter-only, init-time):
        #   proj[v] = table[v] @ W_ih + bias.  Forward only DMA-gathers rows.
        # v_blk capped at 256 so the f32 output block fits v5e's default scoped VMEM.
        v_blk = min(256, _round_up(input_size, 16))
        v_pad = _round_up(input_size, v_blk)
        table_pad = jnp.zeros((v_pad, embedding_dim),
                              jnp.float32).at[:input_size].set(table)
        # proj kept f32 so single-row DMA scatters are sublane(32-bit)-aligned.
        self.proj = project_table(table_pad.astype(jnp.bfloat16),
                                  w_ih_p.astype(jnp.bfloat16), bias_p, v_blk)

    @functools.partial(jax.jit, static_argnums=0)
    def __call__(self, encoder_input):
        # encoder_input: (B, T) int32 token ids (batch_first, like PyTorch)
        b, t = encoder_input.shape
        t_blk = min(8, t)                 # timesteps gathered/computed per block
        t_pad = _round_up(t, t_blk)
        n_blk = t_pad // t_blk

        # TODO(synk): nn.Dropout is eval-mode identity here; training-mode parity
        # would need a PRNG mask on the embeddings (incompatible with the folded
        # projection).  nn.Embedding would raise on out-of-range ids; we clamp.
        idx = jnp.clip(encoder_input.astype(jnp.int32), 0, self.vocab - 1)
        # Only the tiny int index array is transposed/padded (time-major ids).
        idx_tb = jnp.zeros((t_pad, b), jnp.int32).at[:t, :].set(idx.T)

        h_last, c_last = encoder_lstm_fused(
            idx_tb.reshape(-1), self.proj, self.w_hh_bf16,
            batch=b, t_blk=t_blk, n_blk=n_blk, h_pad=self.h_pad, seq_len=t)

        # Match PyTorch LSTM return: (num_layers=1, B, H); drop lane padding.
        return (h_last[None, :, :self.hidden_size],
                c_last[None, :, :self.hidden_size])


if __name__ == "__main__":
    key = jax.random.PRNGKey(0)
    k_model, k_data = jax.random.split(key)

    vocab_size = 16
    hidden_size = 32
    embedding_dim = 32
    batch = 2
    seq = 8

    enc = EncoderPallas(vocab_size, hidden_size, embedding_dim, k_model)
    encoder_input = jax.random.randint(
        k_data, (batch, seq), 0, vocab_size, dtype=jnp.int32)

    hidden, cell = enc(encoder_input)
    jax.block_until_ready((hidden, cell))

    assert hidden.shape == (1, batch, hidden_size)
    assert cell.shape == (1, batch, hidden_size)
    print("KERNEL_OK")
</pallas_src>

<mosaic_0001>
module attributes {stable_mosaic.version = 11 : i64} {
  func.func @_proj_kernel(%arg0: i32, %arg1: memref<16x32xbf16, #tpu.memory_space<vmem>>, %arg2: memref<32x512xbf16, #tpu.memory_space<vmem>>, %arg3: memref<1x512xf32, #tpu.memory_space<vmem>>, %arg4: memref<16x512xf32, #tpu.memory_space<vmem>>) attributes {dimension_semantics = [#tpu.dimension_semantics<parallel>], iteration_bounds = array<i64: 1>, scalar_prefetch = 0 : i64, scratch_operands = 0 : i64, tpu.core_type = #tpu.core_type<tc>, window_params = [{transform_indices = @transform_0, window_bounds = array<i64: 16, 32>}, {pipeline_mode = #tpu.pipeline_mode<synchronous>, transform_indices = @transform_1, window_bounds = array<i64: 32, 512>}, {pipeline_mode = #tpu.pipeline_mode<synchronous>, transform_indices = @transform_2, window_bounds = array<i64: 1, 512>}, {transform_indices = @transform_3, window_bounds = array<i64: 16, 512>}]} {
    %c0 = arith.constant 0 : index
    %c0_0 = arith.constant 0 : index
    %0 = vector.load %arg1[%c0, %c0_0] : memref<16x32xbf16, #tpu.memory_space<vmem>>, vector<16x32xbf16>
    %c0_1 = arith.constant 0 : index
    %c0_2 = arith.constant 0 : index
    %1 = vector.load %arg2[%c0_1, %c0_2] : memref<32x512xbf16, #tpu.memory_space<vmem>>, vector<32x512xbf16>
    %cst = arith.constant dense<0.000000e+00> : vector<16x512xf32>
    %2 = tpu.matmul %0, %1, %cst {dimension_numbers = #tpu.dot_dimension_numbers<[1], [0], [0], [1], [0, 0, 1, 1], [], []>} : vector<16x32xbf16>, vector<32x512xbf16>, vector<16x512xf32> -> vector<16x512xf32>
    %c0_3 = arith.constant 0 : index
    %c0_4 = arith.constant 0 : index
    %3 = vector.load %arg3[%c0_3, %c0_4] : memref<1x512xf32, #tpu.memory_space<vmem>>, vector<1x512xf32>
    %4 = vector.broadcast %3 : vector<1x512xf32> to vector<16x512xf32>
    %5 = arith.addf %2, %4 : vector<16x512xf32>
    %c0_5 = arith.constant 0 : index
    %c0_6 = arith.constant 0 : index
    %6 = vector.load %arg4[%c0_5, %c0_6] : memref<16x512xf32, #tpu.memory_space<vmem>>, vector<16x512xf32>
    tpu.vector_store %arg4[%c0_5, %c0_6], %5 {strides = array<i32>} : memref<16x512xf32, #tpu.memory_space<vmem>>, vector<16x512xf32>,
    return
  }
  func.func @transform_0(%arg0: i32) -> (i32, i32) {
    %c0_i32 = arith.constant 0 : i32
    %c0_i32_0 = arith.constant 0 : i32
    return %arg0, %c0_i32 : i32, i32
  }
  func.func @transform_1(%arg0: i32) -> (i32, i32) {
    %c0_i32 = arith.constant 0 : i32
    %c0_i32_0 = arith.constant 0 : i32
    %c0_i32_1 = arith.constant 0 : i32
    return %c0_i32, %c0_i32_0 : i32, i32
  }
  func.func @transform_2(%arg0: i32) -> (i32, i32) {
    %c0_i32 = arith.constant 0 : i32
    %c0_i32_0 = arith.constant 0 : i32
    %c0_i32_1 = arith.constant 0 : i32
    return %c0_i32, %c0_i32_0 : i32, i32
  }
  func.func @transform_3(%arg0: i32) -> (i32, i32) {
    %c0_i32 = arith.constant 0 : i32
    %c0_i32_0 = arith.constant 0 : i32
    return %arg0, %c0_i32 : i32, i32
  }
}

</mosaic_0001>

<bundles_post_ra>
// kernel: tpu_custom_call.1
= control target key start
LH: loop header
LB: loop body
LE: loop exit
PB: predicated region body
PF: predicated region fallthrough
CT: control target
= control target key end

     0   :  { %8 = vsyncpa [#allocation3], 0  ;;  %s417_s0 = inlined_call_operand.hbm [shape: bf16[16,32], index: 0, kind: input, shape index: {}]   ;;  %s418_s1 = inlined_call_operand.hbm [shape: bf16[32,512], index: 1, kind: input, shape index: {}]   ;;  %s419_s2 = inlined_call_operand.hbm [shape: f32[1,512], index: 2, kind: input, shape index: {}]   ;;  %s420_s3 = inlined_call_operand.hbm [shape: f32[16,512], index: 3, kind: output, shape index: {}]  }
   0x1   :  { %9 = vsyncpa [#allocation6], 0  ;;  %s28_s14 = sshll.u32 %s418_s1, 4  ;;  %s29_s14 = int_to_ptr.hbm [resolvable:$true] %s28_s14 }
   0x2   :  { %10 = vsyncpa [#allocation4], 0  ;;  %s375_s15 = smov [#allocation5]   ;;  %s15_s19 = sshll.u32 %s417_s0, 4  ;;  %s16_s19 = int_to_ptr.hbm [resolvable:$true] %s15_s19 }
   0x3   :  { %s30_s16 = sshll.u32 %s375_s15, 4  ;;  %s376_s20 = smov 256   ;;  %s31_s16 = int_to_ptr.vmem [resolvable:$true] %s30_s16 }
   0x4   :  { %s377_s21 = smov 16   ;;  %s378_s22 = smov [#allocation2]  }
   0x5   :  { %36 = dma.hbm_to_vmem [thread:$0]  %s29_s14, 1024, %s31_s16, [#allocation6], %s376_s20, %s376_s20, %s377_s21  }
   0x6   :  { %s17_s23 = sshll.u32 %s378_s22, 4  ;;  %s379_s24 = smov 64   ;;  %s18_s23 = int_to_ptr.vmem [resolvable:$true] %s17_s23 }
   0x7   :  { %s380_s25 = smov 4   ;;  %s42_s27 = sshll.u32 %s419_s2, 4  ;;  %s43_s27 = int_to_ptr.hbm [resolvable:$true] %s42_s27 }
   0x8   :  { %23 = dma.hbm_to_vmem [thread:$0]  %s16_s19, 128, %s18_s23, [#allocation3], %s379_s24, %s379_s24, %s380_s25  }
   0x9   :  { %s381_s28 = smov [#allocation7]  }
   0xa   :  { %s44_s29 = sshll.u32 %s381_s28, 4  ;;  %s45_s29 = int_to_ptr.vmem [resolvable:$true] %s44_s29 }
   0xb   :  { %47 = dma.hbm_to_vmem [thread:$0]  %s43_s27, 64, %s45_s29, [#allocation6]  }
   0xc   :  { %369 = dma.done.wait [#allocation3], 128  }
   0xd   :  { %370 = vsyncadd [#allocation3], 4294967168 }
   0xe   :  { %371 = dma.done.wait [#allocation6], 1088  }
   0xf   :  { %372 = vsyncadd [#allocation6], 4294966208  ;;  %v236_v0 = vld [vmem:[#allocation5 + $0x20] sm:$0xf]  ;;  %v261_v1 = vld [vmem:[#allocation5 + $0x2c] sm:$0xf0] }
  0x10   :  { %v259_v2 = vld [vmem:[#allocation5 + $0x24] sm:$0xf]  ;;  %v237_v3 = vor.u32 %v261_v1, %v236_v0  ;;  %v238_v4 = vld [vmem:[#allocation5 + $0x30] sm:$0xf0]  ;;  %v244_v5 = vld [vmem:[#allocation5 + $0x28] sm:$0xf] }
  0x11   :  { %v262_v6 = vld [vmem:[#allocation5 + $0x34] sm:$0xf0]  ;;  %v241_v7 = vor.u32 %v259_v2, %v238_v4  ;;  %v260_v9 = vld [vmem:[#allocation5 + $0x2c] sm:$0xf]  ;;  %v246_v10 = vld [vmem:[#allocation5 + $0x38] sm:$0xf0] }
  0x12   :  { %v245_v8 = vor.u32 %v262_v6, %v244_v5  ;;  %v220_v11 = vld [vmem:[#allocation5] sm:$0xf]  ;;  %136 = vmatpush.bf16.msra.mxu0 %v237_v3  ;;  %v249_v12 = vor.u32 %v260_v9, %v246_v10  ;;  %v257_v13 = vld [vmem:[#allocation5 + $0xc] sm:$0xf0]  ;;  %v255_v14 = vld [vmem:[#allocation5 + $0x4] sm:$0xf] }
  0x13   :  { %v222_v15 = vld [vmem:[#allocation5 + $0x10] sm:$0xf0]  ;;  %150 = vmatpush.bf16.msra.mxu1 %v241_v7  ;;  %v221_v16 = vor.u32 %v257_v13, %v220_v11  ;;  %v228_v18 = vld [vmem:[#allocation5 + $0x8] sm:$0xf]  ;;  %v258_v19 = vld [vmem:[#allocation5 + $0x14] sm:$0xf0] }
  0x14   :  { %164 = vmatpush.bf16.msra.mxu2 %v245_v8  ;;  %v225_v17 = vor.u32 %v255_v14, %v222_v15  ;;  %v256_v20 = vld [vmem:[#allocation5 + $0xc] sm:$0xf]  ;;  %178 = vmatpush.bf16.msra.mxu3 %v249_v12  ;;  %v229_v21 = vor.u32 %v258_v19, %v228_v18  ;;  %v230_v22 = vld [vmem:[#allocation5 + $0x18] sm:$0xf0]  ;;  %vm126_vm0 = vcmask 261120   ;;  %s382_s0 = smov [#allocation8]  }
  0x15   :  { %v233_v23 = vor.u32 %v256_v20, %v230_v22  ;;  %v254_v24 = vld [vmem:[#allocation2] sm:$0xff]  ;;  %v71_v25 = vld [vmem:[#allocation7] sm:$0xf]  ;;  %s198_s2 = sshll.u32 %s382_s0, 4  ;;  %s200_s5 = sshll.u32 %s420_s3, 4  ;;  %s199_s2 = int_to_ptr.vmem [resolvable:$true] %s198_s2  ;;  %s201_s5 = int_to_ptr.hbm [resolvable:$true] %s200_s5 }
  0x16   :  { %137 = vmatpush.bf16.msra.mxu0 %v221_v16  ;;  %v73_v26 = vperm.slane %v71_v25, 0  ;;  %v74_v27 = vperm.slane %v71_v25, 1  ;;  %v75_v32 = vperm.slane %v71_v25, 2  ;;  %v76_v33 = vperm.slane %v71_v25, 3  ;;  %s383_s6 = smov 512   ;;  %s384_s7 = smov 32  }
  0x17   :  { %151 = vmatpush.bf16.msra.mxu1 %v225_v17 }
  0x18   :  { %165 = vmatpush.bf16.msra.mxu2 %v229_v21  ;;  %179 = vmatpush.bf16.msra.mxu3 %v233_v23 }
  0x19   :  { %250 = vmatmul.msk.bf16.vlgmr.msra.gmra.mxu0 %vm126_vm0, %v254_v24 }
  0x1a   :  { %251 = vmatmul.msk.bf16.vlgmr.msra.gmra.mxu1 %vm126_vm0, %v254_v24 }
  0x1b   :  { %252 = vmatmul.msk.bf16.vlgmr.msra.gmra.mxu2 %vm126_vm0, %v254_v24  ;;  %253 = vmatmul.msk.bf16.vlgmr.msra.gmra.mxu3 %vm126_vm0, %v254_v24 }
  0x96   :  { %v139_v28 = vpop.f32.mrf.mxu0 }
  0x97   :  { %v140_v29 = vadd.f32 %v139_v28, %v73_v26  ;;  %v153_v30 = vpop.f32.mrf.mxu1 }
  0x98   :  { %v154_v31 = vadd.f32 %v153_v30, %v74_v27 }
  0x99   :  { %186 = vst [vmem:[#allocation8] sm:$0xff] %v140_v29 }
  0x9a   :  { %187 = vst [vmem:[#allocation8 + $0x8] sm:$0xff] %v154_v31 }
  0x9e   :  { %v167_v34 = vpop.f32.mrf.mxu2  ;;  %v181_v36 = vpop.f32.mrf.mxu3 }
  0x9f   :  { %v168_v35 = vadd.f32 %v167_v34, %v75_v32  ;;  %v141_v37 = vpop.f32.mrf.mxu0  ;;  %v182_v38 = vadd.f32 %v181_v36, %v76_v33  ;;  %v155_v40 = vpop.f32.mrf.mxu1 }
  0xa0   :  { %v142_v39 = vadd.f32 %v141_v37, %v73_v26  ;;  %v156_v41 = vadd.f32 %v155_v40, %v74_v27 }
  0xa1   :  { %188 = vst [vmem:[#allocation8 + $0x10] sm:$0xff] %v168_v35 }
  0xa2   :  { %189 = vst [vmem:[#allocation8 + $0x18] sm:$0xff] %v182_v38 }
  0xa3   :  { %190 = vst [vmem:[#allocation8 + $0x20] sm:$0xff] %v142_v39 }
  0xa4   :  { %191 = vst [vmem:[#allocation8 + $0x28] sm:$0xff] %v156_v41 }
  0xa6   :  { %v169_v42 = vpop.f32.mrf.mxu2  ;;  %v183_v44 = vpop.f32.mrf.mxu3 }
  0xa7   :  { %v170_v43 = vadd.f32 %v169_v42, %v75_v32  ;;  %v184_v45 = vadd.f32 %v183_v44, %v76_v33 }
  0xa9   :  { %192 = vst [vmem:[#allocation8 + $0x30] sm:$0xff] %v170_v43 }
  0xaa   :  { %193 = vst [vmem:[#allocation8 + $0x38] sm:$0xff] %v184_v45 }
  0xab   :  { %206 = dma.vmem_to_hbm [thread:$0]  %s199_s2, 1024, %s201_s5, [#allocation4], %s383_s6, %s383_s6, %s384_s7  }
  0xac   :  { %373 = dma.done.wait [#allocation4], 1024  }
  0xad   :  { %374 = vsyncadd [#allocation4], 4294966272 }
  0xae   :  { %211 = vsyncpa [#allocation3], 1 }
  0xaf   :  { %212 = vsyncpa [#allocation6], 1 }
  0xb0   :  { %213 = vsyncpa [#allocation4], 1 }

</bundles_post_ra>
